<compile_context>
chip_gen: v6e
topology: v6e:2x2x1
jax: 0.10.0
libtpu: 0.0.40
codegen_flags: <defaults>
</compile_context>

<pallas_src>
import functools

import numpy as np
import jax
import jax.numpy as jnp
from jax.experimental import pallas as pl
from jax.experimental.pallas import tpu as pltpu


def _round_up(x, m):
    return (x + m - 1) // m * m


# ---------------- fused head (cls+reg 1x1 conv) + CenterPoint box decode ----------------
def _head_decode_kernel(x_ref, w_ref, b_ref, scale_ref, add_ref,
                        reg_ref, cls_ref, dec_ref, *, num_reg, num_cls, mxu_dtype):
    # x_ref:     (1, Cin, T)   feature tile, H*W on lanes (lane-dense)
    # w_ref:     (Cp, Cin)     fused [reg_w; cls_w], rows padded to a multiple of 8
    # b_ref:     (Cp, 1)       fused bias
    # scale_ref: (8A, 1)       per-code-channel decode scale
    # add_ref:   (8A, T)       precomputed positional/offset term for this HW tile
    # outputs:   reg (1, 8A, T), cls (1, A, T), dec (1, 8A, T)
    x = x_ref[0].astype(mxu_dtype)                                     # (Cin, T)
    h = jnp.dot(w_ref[...], x, preferred_element_type=jnp.float32) + b_ref[...]
    reg = h[:num_reg, :]                                               # sublane-aligned slice
    reg_ref[0] = reg
    cls_ref[0] = h[num_reg:num_reg + num_cls, :]
    # decode epilogue rides in free VPU slots while DMA/MXU dominate;
    # sin/cos rows pass through unchanged (atan2 is done in JAX).
    dec_ref[0] = reg * scale_ref[...] + add_ref[...]


def fused_head_decode(x_nchw, w_fused, b_fused, scale_col, add_map, num_reg,
                      *, tile_hw=2048, mxu_dtype=jnp.bfloat16):
    """x (N,Cin,H,W) -> reg (N,8A,HW), cls (N,A,HW), decoded codes (N,8A,HW)."""
    N, Cin, H, W = x_nchw.shape
    HW = H * W
    Ctot = w_fused.shape[0]
    num_cls = Ctot - num_reg

    # pad fused rows to a multiple of 8 (sublane tile); padded rows are never stored.
    Cp = _round_up(Ctot, 8)
    if Cp != Ctot:
        w_fused = jnp.pad(w_fused, ((0, Cp - Ctot), (0, 0)))
        b_fused = jnp.pad(b_fused, (0, Cp - Ctot))

    x = x_nchw.reshape(N, Cin, HW)                        # free reshape, stays NCHW
    tile = min(int(tile_hw), _round_up(HW, 128))          # lane-dense tile, 128-multiple
    grid = (pl.cdiv(HW, tile), N)                         # hw outer: w/b/scale/add stay resident

    kernel = functools.partial(_head_decode_kernel, num_reg=num_reg,
                               num_cls=num_cls, mxu_dtype=mxu_dtype)

    # advisory scheduler hint: 1x1-conv matmul + decode FMA, streaming x once.
    cost = pl.CostEstimate(
        flops=2 * N * HW * (Cp * Cin + num_reg),
        transcendentals=0,
        bytes_accessed=(N * Cin * HW * 4                   # x (read once)
                        + N * (2 * num_reg + num_cls) * HW * 4  # reg/cls/dec writes
                        + pl.cdiv(HW, tile) * num_reg * tile * 4))  # add map reads

    reg_out, cls_out, dec_out = pl.pallas_call(
        kernel,
        out_shape=(
            jax.ShapeDtypeStruct((N, num_reg, HW), jnp.float32),
            jax.ShapeDtypeStruct((N, num_cls, HW), jnp.float32),
            jax.ShapeDtypeStruct((N, num_reg, HW), jnp.float32),
        ),
        grid=grid,
        in_specs=[
            pl.BlockSpec((1, Cin, tile), lambda hw, n: (n, 0, hw)),
            pl.BlockSpec((Cp, Cin), lambda hw, n: (0, 0)),
            pl.BlockSpec((Cp, 1), lambda hw, n: (0, 0)),
            pl.BlockSpec((num_reg, 1), lambda hw, n: (0, 0)),
            pl.BlockSpec((num_reg, tile), lambda hw, n: (0, hw)),
        ],
        out_specs=(
            pl.BlockSpec((1, num_reg, tile), lambda hw, n: (n, 0, hw)),
            pl.BlockSpec((1, num_cls, tile), lambda hw, n: (n, 0, hw)),
            pl.BlockSpec((1, num_reg, tile), lambda hw, n: (n, 0, hw)),
        ),
        compiler_params=pltpu.CompilerParams(
            dimension_semantics=("parallel", "parallel")),
        cost_estimate=cost,
    )(x, w_fused.astype(mxu_dtype), b_fused.reshape(Cp, 1).astype(jnp.float32),
      scale_col, add_map)
    return reg_out, cls_out, dec_out


@functools.lru_cache(maxsize=16)
def _decode_constants(A, H, W, out_size_factor, voxel_size, lidar_range):
    """Per-code-channel scale (8A,1) and additive positional map (8A,HW) in f32."""
    osf = float(out_size_factor)
    v0, v1, v2 = (float(v) for v in voxel_size)
    HW = H * W
    scale8 = np.array([osf * v0, osf * v1, osf * v2,
                       osf * v0, osf * v1, osf * v2, 1.0, 1.0], np.float32)
    xs = np.tile(np.arange(W, dtype=np.float32), H)       # pixel p -> column p % W
    ys = np.repeat(np.arange(H, dtype=np.float32), W)     # pixel p -> row    p // W
    add8 = np.zeros((8, HW), np.float32)
    add8[0] = xs * (osf * v0) + float(lidar_range[0])
    add8[1] = ys * (osf * v1) + float(lidar_range[1])
    add8[2] = float(lidar_range[2])
    scale = np.tile(scale8.reshape(8, 1), (A, 1))         # row a*8+c -> scale8[c]
    add = np.tile(add8, (A, 1))                           # row a*8+c -> add8[c]
    return jnp.asarray(scale), jnp.asarray(add)


def _codes_to_boxes(dec_chw_last):
    """(..., HW, 8) decoded codes -> (..., HW, 7) boxes (atan2 for yaw)."""
    rot = jnp.arctan2(dec_chw_last[..., 6:7], dec_chw_last[..., 7:8])
    return jnp.concatenate([dec_chw_last[..., :6], rot], axis=-1)


# ----------------------------------- module port -----------------------------------
class CenterPointCoDrivingPallas:
    def __init__(self, out_channel=32, anchor_number=2,
                 voxel_size=(0.4, 0.4, 4.0),
                 lidar_range=(-51.2, -51.2, -3.0, 51.2, 51.2, 1.0),
                 out_size_factor=2, tile_hw=2048,
                 mxu_dtype=jnp.bfloat16, key=None):
        if key is None:
            key = jax.random.PRNGKey(0)
        self.out_channel = out_channel
        self.anchor_number = anchor_number
        self.voxel_size = tuple(float(v) for v in voxel_size)
        self.lidar_range = tuple(float(v) for v in lidar_range)
        self.out_size_factor = out_size_factor
        self.tile_hw = tile_hw
        self.mxu_dtype = mxu_dtype

        k1, k2 = jax.random.split(key)
        pi = 0.01
        # cls_head: Conv2d(out_channel, A, 1); bias = -log((1-pi)/pi)
        self.cls_w = jax.random.normal(k1, (anchor_number, out_channel),
                                       jnp.float32) * 0.05
        self.cls_b = jnp.full((anchor_number,), -float(np.log((1 - pi) / pi)),
                              jnp.float32)
        # reg_head: Conv2d(out_channel, 8A, 1); weight ~ N(0, 0.001)
        self.reg_w = jax.random.normal(k2, (8 * anchor_number, out_channel),
                                       jnp.float32) * 0.001
        self.reg_b = jnp.zeros((8 * anchor_number,), jnp.float32)
        # fused head: reg rows first (sublane-aligned 8A block), cls rows after.
        self.head_w = jnp.concatenate([self.reg_w, self.cls_w], axis=0)   # (9A, Cin)
        self.head_b = jnp.concatenate([self.reg_b, self.cls_b], axis=0)   # (9A,)

        self._jit_forward = jax.jit(self._forward_impl)

    # note: decode matches the provided torch generate_predicted_boxes (linear dim
    # scaling, no exp()), as in the reference module.
    def _forward_impl(self, spatial_features_2d, record_len):
        N, Cin, H, W = spatial_features_2d.shape
        A = self.anchor_number
        num_reg = 8 * A
        HW = H * W

        scale, add = _decode_constants(A, H, W, self.out_size_factor,
                                       self.voxel_size, self.lidar_range)
        reg_out, cls_out, dec_out = fused_head_decode(
            spatial_features_2d, self.head_w, self.head_b, scale, add, num_reg,
            tile_hw=self.tile_hw, mxu_dtype=self.mxu_dtype)

        psm_single = cls_out.reshape(N, A, H, W)          # == cls_head(x)
        rm_single = reg_out.reshape(N, num_reg, H, W)     # == reg_head(x)

        # early-fusion branch: ego agent (first of each sample group) selection.
        csum = jnp.cumsum(record_len)
        ego_idx = jnp.concatenate([jnp.zeros((1,), csum.dtype), csum[:-1]])
        fused_feature = jnp.take(spatial_features_2d, ego_idx, axis=0)
        # cls_head/reg_head on fused_feature == gathering the per-agent head outputs.
        cls = jnp.take(psm_single, ego_idx, axis=0)
        bbox = jnp.take(rm_single, ego_idx, axis=0)

        # finish generate_predicted_boxes in JAX: code-last reorder + atan2 (XLA fuses).
        # TODO(synk): atan2 has no guaranteed Mosaic lowering; kept outside the kernel.
        dec_all = dec_out.reshape(N, A, 8, HW)
        # single-agent decode only needs class 0 (first 8 code channels).
        dec0 = jnp.transpose(dec_all[:, 0], (0, 2, 1))                    # (N, HW, 8)
        reg_preds_single = _codes_to_boxes(dec0)                          # (N, HW, 7)
        # multiclass decode only needed for ego agents -> gather before the transpose.
        dec_ego = jnp.transpose(jnp.take(dec_all, ego_idx, axis=0),
                                (0, 1, 3, 2))                             # (B, A, HW, 8)
        reg_preds_multiclass = _codes_to_boxes(dec_ego)                   # (B, A, HW, 7)
        reg_preds = reg_preds_multiclass[:, 0]            # decode of bbox[..., :8]

        return {
            'cls_preds': cls,
            'reg_preds': reg_preds,
            'reg_preds_multiclass': reg_preds_multiclass,
            'bbox_preds': bbox,
            'fused_feature': fused_feature,
            'cls_preds_single': psm_single,
            'reg_preds_single': reg_preds_single,
            'bbox_preds_single': rm_single,
            'comm_rate': jnp.zeros((), jnp.float32),
            'cls_preds_single_ego': cls,
            'reg_preds_multiclass_single_ego': reg_preds_multiclass,
            'bbox_preds_single_ego': bbox,
        }

    def forward(self, spatial_features_2d, record_len):
        record_len = jnp.asarray(record_len, jnp.int32)
        return self._jit_forward(spatial_features_2d, record_len)

    __call__ = forward


# ------------------------------- reference (numpy) -------------------------------
def _ref_decode_codes(codes, H, W, osf, vs, lr):
    codes = np.asarray(codes, np.float64)
    B, HW, _ = codes.shape
    reg = codes[..., 0:2]
    dim_h = codes[..., 3:4] * osf * vs[0]
    dim_w = codes[..., 4:5] * osf * vs[1]
    dim_l = codes[..., 5:6] * osf * vs[2]
    hei = codes[..., 2:3] * osf * vs[2] + lr[2]
    rot = np.arctan2(codes[..., 6:7], codes[..., 7:8])
    ys, xs = np.meshgrid(np.arange(H), np.arange(W), indexing='ij')
    xs = xs.reshape(1, HW, 1) + reg[..., 0:1]
    ys = ys.reshape(1, HW, 1) + reg[..., 1:2]
    xs = xs * osf * vs[0] + lr[0]
    ys = ys * osf * vs[1] + lr[1]
    return np.concatenate([xs, ys, hei, dim_h, dim_w, dim_l, rot], axis=2)


if __name__ == "__main__":
    key = jax.random.PRNGKey(0)
    C, H, W = 32, 16, 16
    A = 2
    record_len = [2, 1]                   # 2 batch samples, 3 agents total
    N = sum(record_len)

    k_feat, k_param = jax.random.split(key)
    spatial_features_2d = jax.random.normal(k_feat, (N, C, H, W), jnp.float32)

    model = CenterPointCoDrivingPallas(out_channel=C, anchor_number=A, key=k_param)
    out = model.forward(spatial_features_2d, record_len)
    for v in out.values():
        if isinstance(v, jax.Array):
            jax.block_until_ready(v)

    # --- head check: fused cls+reg 1x1 conv vs f64 reference with matched bf16 rounding
    def _rounded(a):
        return np.asarray(jnp.asarray(a).astype(model.mxu_dtype).astype(jnp.float32),
                          np.float64)

    xr = _rounded(spatial_features_2d)                     # (N, C, H, W)
    wr = _rounded(model.head_w)                            # (9A, C), reg rows first
    ref_head = (np.einsum('oc,nchw->nohw', wr, xr)
                + np.asarray(model.head_b, np.float64)[None, :, None, None])
    np.testing.assert_allclose(np.asarray(out['bbox_preds_single']),
                               ref_head[:, :8 * A], rtol=1e-4, atol=1e-5)
    np.testing.assert_allclose(np.asarray(out['cls_preds_single']),
                               ref_head[:, 8 * A:], rtol=1e-4, atol=1e-4)

    # --- decode check vs numpy reference of generate_predicted_boxes
    osf, vs, lr = model.out_size_factor, model.voxel_size, model.lidar_range
    rm = np.asarray(out['bbox_preds_single'])              # (N, 8A, H, W)
    codes = np.transpose(rm, (0, 2, 3, 1)).reshape(N, H * W, 8 * A)
    ref_single = _ref_decode_codes(codes[..., :8], H, W, osf, vs, lr)
    np.testing.assert_allclose(np.asarray(out['reg_preds_single']), ref_single,
                               rtol=1e-4, atol=1e-3)

    bbox = np.asarray(out['bbox_preds'])                   # (B, 8A, H, W)
    B = bbox.shape[0]
    codes_b = np.transpose(bbox, (0, 2, 3, 1)).reshape(B, H * W, 8 * A)
    ref_mc = np.stack([_ref_decode_codes(codes_b[..., 8 * a:8 * (a + 1)],
                                         H, W, osf, vs, lr) for a in range(A)], axis=1)
    np.testing.assert_allclose(np.asarray(out['reg_preds_multiclass']), ref_mc,
                               rtol=1e-4, atol=1e-3)
    np.testing.assert_allclose(np.asarray(out['reg_preds']), ref_mc[:, 0],
                               rtol=1e-4, atol=1e-3)

    # --- ego-selection consistency with the early-fusion regroup semantics
    ego = np.concatenate([[0], np.cumsum(record_len)[:-1]])
    np.testing.assert_array_equal(np.asarray(out['cls_preds']),
                                  np.asarray(out['cls_preds_single'])[ego])
    np.testing.assert_array_equal(np.asarray(out['bbox_preds']),
                                  np.asarray(out['bbox_preds_single'])[ego])
    np.testing.assert_array_equal(np.asarray(out['fused_feature']),
                                  np.asarray(spatial_features_2d)[ego])

    print("KERNEL_OK")
</pallas_src>

<mosaic_0001>
module attributes {stable_mosaic.version = 11 : i64} {
  func.func @_head_decode_kernel(%arg0: i32, %arg1: i32, %arg2: memref<1x32x256xf32, #tpu.memory_space<vmem>>, %arg3: memref<24x32xbf16, #tpu.memory_space<vmem>>, %arg4: memref<24x1xf32, #tpu.memory_space<vmem>>, %arg5: memref<16x1xf32, #tpu.memory_space<vmem>>, %arg6: memref<16x256xf32, #tpu.memory_space<vmem>>, %arg7: memref<1x16x256xf32, #tpu.memory_space<vmem>>, %arg8: memref<1x2x256xf32, #tpu.memory_space<vmem>>, %arg9: memref<1x16x256xf32, #tpu.memory_space<vmem>>) attributes {dimension_semantics = [#tpu.dimension_semantics<parallel>, #tpu.dimension_semantics<parallel>], iteration_bounds = array<i64: 1, 3>, scalar_prefetch = 0 : i64, scratch_operands = 0 : i64, tpu.core_type = #tpu.core_type<tc>, window_params = [{transform_indices = @transform_0, window_bounds = array<i64: 1, 32, 256>}, {pipeline_mode = #tpu.pipeline_mode<synchronous>, transform_indices = @transform_1, window_bounds = array<i64: 24, 32>}, {pipeline_mode = #tpu.pipeline_mode<synchronous>, transform_indices = @transform_2, window_bounds = array<i64: 24, 1>}, {pipeline_mode = #tpu.pipeline_mode<synchronous>, transform_indices = @transform_3, window_bounds = array<i64: 16, 1>}, {transform_indices = @transform_4, window_bounds = array<i64: 16, 256>}, {transform_indices = @transform_5, window_bounds = array<i64: 1, 16, 256>}, {transform_indices = @transform_6, window_bounds = array<i64: 1, 2, 256>}, {transform_indices = @transform_7, window_bounds = array<i64: 1, 16, 256>}]} {
    %c0 = arith.constant 0 : index
    %c0_0 = arith.constant 0 : index
    %c0_1 = arith.constant 0 : index
    %0 = vector.load %arg2[%c0, %c0_0, %c0_1] : memref<1x32x256xf32, #tpu.memory_space<vmem>>, vector<1x32x256xf32>
    %1 = vector.shape_cast %0 : vector<1x32x256xf32> to vector<32x256xf32>
    %2 = arith.truncf %1 : vector<32x256xf32> to vector<32x256xbf16>
    %c0_2 = arith.constant 0 : index
    %c0_3 = arith.constant 0 : index
    %3 = vector.load %arg3[%c0_2, %c0_3] : memref<24x32xbf16, #tpu.memory_space<vmem>>, vector<24x32xbf16>
    %cst = arith.constant dense<0.000000e+00> : vector<24x256xf32>
    %4 = tpu.matmul %3, %2, %cst {dimension_numbers = #tpu.dot_dimension_numbers<[1], [0], [0], [1], [0, 0, 1, 1], [], []>} : vector<24x32xbf16>, vector<32x256xbf16>, vector<24x256xf32> -> vector<24x256xf32>
    %c0_4 = arith.constant 0 : index
    %c0_5 = arith.constant 0 : index
    %5 = vector.load %arg4[%c0_4, %c0_5] : memref<24x1xf32, #tpu.memory_space<vmem>>, vector<24x1xf32>
    %6 = vector.broadcast %5 : vector<24x1xf32> to vector<24x256xf32>
    %7 = arith.addf %4, %6 : vector<24x256xf32>
    %8 = vector.extract_strided_slice %7 {offsets = [0, 0], sizes = [16, 256], strides = [1, 1]} : vector<24x256xf32> to vector<16x256xf32>
    %c0_6 = arith.constant 0 : index
    %c0_7 = arith.constant 0 : index
    %c0_8 = arith.constant 0 : index
    %9 = vector.load %arg7[%c0_6, %c0_7, %c0_8] : memref<1x16x256xf32, #tpu.memory_space<vmem>>, vector<1x16x256xf32>
    %10 = vector.shape_cast %9 : vector<1x16x256xf32> to vector<16x256xf32>
    %11 = vector.shape_cast %8 : vector<16x256xf32> to vector<1x16x256xf32>
    tpu.vector_store %arg7[%c0_6, %c0_7, %c0_8], %11 {strides = array<i32>} : memref<1x16x256xf32, #tpu.memory_space<vmem>>, vector<1x16x256xf32>,
    %12 = vector.extract_strided_slice %7 {offsets = [16, 0], sizes = [2, 256], strides = [1, 1]} : vector<24x256xf32> to vector<2x256xf32>
    %c0_9 = arith.constant 0 : index
    %c0_10 = arith.constant 0 : index
    %c0_11 = arith.constant 0 : index
    %13 = vector.load %arg8[%c0_9, %c0_10, %c0_11] : memref<1x2x256xf32, #tpu.memory_space<vmem>>, vector<1x2x256xf32>
    %14 = vector.shape_cast %13 : vector<1x2x256xf32> to vector<2x256xf32>
    %15 = vector.shape_cast %12 : vector<2x256xf32> to vector<1x2x256xf32>
    tpu.vector_store %arg8[%c0_9, %c0_10, %c0_11], %15 {strides = array<i32>} : memref<1x2x256xf32, #tpu.memory_space<vmem>>, vector<1x2x256xf32>,
    %c0_12 = arith.constant 0 : index
    %c0_13 = arith.constant 0 : index
    %16 = vector.load %arg5[%c0_12, %c0_13] : memref<16x1xf32, #tpu.memory_space<vmem>>, vector<16x1xf32>
    %17 = vector.broadcast %16 : vector<16x1xf32> to vector<16x256xf32>
    %18 = arith.mulf %8, %17 : vector<16x256xf32>
    %c0_14 = arith.constant 0 : index
    %c0_15 = arith.constant 0 : index
    %19 = vector.load %arg6[%c0_14, %c0_15] : memref<16x256xf32, #tpu.memory_space<vmem>>, vector<16x256xf32>
    %20 = arith.addf %18, %19 : vector<16x256xf32>
    %c0_16 = arith.constant 0 : index
    %c0_17 = arith.constant 0 : index
    %c0_18 = arith.constant 0 : index
    %21 = vector.load %arg9[%c0_16, %c0_17, %c0_18] : memref<1x16x256xf32, #tpu.memory_space<vmem>>, vector<1x16x256xf32>
    %22 = vector.shape_cast %21 : vector<1x16x256xf32> to vector<16x256xf32>
    %23 = vector.shape_cast %20 : vector<16x256xf32> to vector<1x16x256xf32>
    tpu.vector_store %arg9[%c0_16, %c0_17, %c0_18], %23 {strides = array<i32>} : memref<1x16x256xf32, #tpu.memory_space<vmem>>, vector<1x16x256xf32>,
    return
  }
  func.func @transform_0(%arg0: i32, %arg1: i32) -> (i32, i32, i32) {
    %c0_i32 = arith.constant 0 : i32
    %c0_i32_0 = arith.constant 0 : i32
    return %arg1, %c0_i32, %arg0 : i32, i32, i32
  }
  func.func @transform_1(%arg0: i32, %arg1: i32) -> (i32, i32) {
    %c0_i32 = arith.constant 0 : i32
    %c0_i32_0 = arith.constant 0 : i32
    %c0_i32_1 = arith.constant 0 : i32
    return %c0_i32, %c0_i32_0 : i32, i32
  }
  func.func @transform_2(%arg0: i32, %arg1: i32) -> (i32, i32) {
    %c0_i32 = arith.constant 0 : i32
    %c0_i32_0 = arith.constant 0 : i32
    %c0_i32_1 = arith.constant 0 : i32
    return %c0_i32, %c0_i32_0 : i32, i32
  }
  func.func @transform_3(%arg0: i32, %arg1: i32) -> (i32, i32) {
    %c0_i32 = arith.constant 0 : i32
    %c0_i32_0 = arith.constant 0 : i32
    %c0_i32_1 = arith.constant 0 : i32
    return %c0_i32, %c0_i32_0 : i32, i32
  }
  func.func @transform_4(%arg0: i32, %arg1: i32) -> (i32, i32) {
    %c0_i32 = arith.constant 0 : i32
    %c0_i32_0 = arith.constant 0 : i32
    return %c0_i32, %arg0 : i32, i32
  }
  func.func @transform_5(%arg0: i32, %arg1: i32) -> (i32, i32, i32) {
    %c0_i32 = arith.constant 0 : i32
    %c0_i32_0 = arith.constant 0 : i32
    return %arg1, %c0_i32, %arg0 : i32, i32, i32
  }
  func.func @transform_6(%arg0: i32, %arg1: i32) -> (i32, i32, i32) {
    %c0_i32 = arith.constant 0 : i32
    %c0_i32_0 = arith.constant 0 : i32
    return %arg1, %c0_i32, %arg0 : i32, i32, i32
  }
  func.func @transform_7(%arg0: i32, %arg1: i32) -> (i32, i32, i32) {
    %c0_i32 = arith.constant 0 : i32
    %c0_i32_0 = arith.constant 0 : i32
    return %arg1, %c0_i32, %arg0 : i32, i32, i32
  }
}

</mosaic_0001>

<bundles_post_ra>
// kernel: _forward_impl.1
= control target key start
LH: loop header
LB: loop body
LE: loop exit
PB: predicated region body
PF: predicated region fallthrough
CT: control target
= control target key end

     0   :  { %s856_s24 = smov 0   ;;  %s858_s25 = smov 0   ;;  %s939_s0 = inlined_call_operand.vmem [shape: f32[3,32,256], index: 0, kind: input, shape index: {}]   ;;  %s940_s1 = inlined_call_operand.vmem [shape: bf16[24,32], index: 1, kind: input, shape index: {}]   ;;  %s941_s2 = inlined_call_operand.vmem [shape: f32[24,1], index: 2, kind: input, shape index: {}]   ;;  %s942_s3 = inlined_call_operand.vmem [shape: f32[16,1], index: 3, kind: input, shape index: {}]   ;;  %s943_s4 = inlined_call_operand.vmem [shape: f32[16,256], index: 4, kind: input, shape index: {}]   ;;  %s944_s5 = inlined_call_operand.vmem [shape: f32[3,16,256], index: 5, kind: output, shape index: {0}]   ;;  %s945_s6 = inlined_call_operand.vmem [shape: f32[3,2,256], index: 6, kind: output, shape index: {1}]   ;;  %s946_s7 = inlined_call_operand.vmem [shape: f32[3,16,256], index: 7, kind: output, shape index: {2}]  }
   0x1   :  { %s860_s26 = smov 0  }
   0x2 LB: > { %s27_s27 = sadd.s32 1, %s809_s25  ;;  %p738_p0 = scmp.ge.s32.totalorder %s813_s26, 1  ;;  %s813_s26 = sphi %s860_s26, %s18_s26   ;;  %s809_s25 = sphi %s858_s25, %s948_s25   ;;  %s805_s24 = sphi %s856_s24, %s947_s24  }
   0x3   : > { %p28_p1 = scmp.ge.s32.totalorder %s27_s27, 3  ;;  %p278_p2 = scmp.lt.s32.totalorder %s813_s26, 4 }
   0x5   : > { %s950_s27 = smov (%p28_p1, %s27_s27), 0  ;;  %p279_p3 = pnand %p738_p0, %p278_p2 }
   0x6   : > { %p342_p4 = scmp.lt.s32.totalorder (!%p279_p3), %s805_s24, 2 }
   0x7   : > { %282 = sbr.rel (%p279_p3) target bundleno = 233 (0xe9), region = 40 }
   0xc   : > { %v815_v0 = vmov 0   ;;  %s952_s24 = smov (!%p342_p4, %s805_s24), 2  ;;  %v403_v1 = vld [vmem:[%s941_s2] sm:$0xff]  ;;  %v405_v2 = vld [vmem:[%s941_s2 + $0x10] sm:$0xff]  ;;  %v404_v3 = vld [vmem:[%s941_s2 + $0x8] sm:$0xff]  ;;  %vm429_vm0 = vcmask 261120  }
   0xd   : > { %468 = vmatprep.mubr.bf16.mxu0 %v815_v0  ;;  %478 = vmatprep.mubr.bf16.mxu1 %v815_v0  ;;  %s754_s9 = sshll.u32 %s952_s24, 6  ;;  %v503_v4 = vld [vmem:[%s942_s3] sm:$0xff]  ;;  %v504_v16 = vld [vmem:[%s942_s3 + $0x8] sm:$0xff]  ;;  %s755_s23 = sshll.u32 %s952_s24, 5  ;;  %v521_v42 = vld [vmem:[%s943_s4 + $0x10] sm:$0xff] }
   0xe   : > { %787 = vset.pattern.permute.xlu0 %v815_v0  ;;  %788 = vset.pattern.permute.xlu1 %v815_v0  ;;  %s349_s16 = scalar_lea.vmem %s939_s0, %s754_s9  ;;  %v789_v18 = vld [vmem:[%s940_s1] sm:$0xff]   ;;  %v790_v19 = vld [vmem:[%s940_s1 + $0x8] ss:$0 sps:$4 sm:$0xff]   ;;  %s905_s30 = scalar_lea.vmem %s944_s5, %s755_s23  ;;  %v522_v48 = vld [vmem:[%s943_s4 + $0x18] sm:$0xff] }
   0xf   : > { %408 = vperm.xlu0 %787, %v403_v1   ;;  %418 = vperm.xlu1 %788, %v405_v2   ;;  %v393_v5 = vld [vmem:[%s349_s16 + $0x28] sm:$0xff]  ;;  %v395_v6 = vld [vmem:[%s349_s16 + $0x38] sm:$0xff]  ;;  %v392_v7 = vld [vmem:[%s349_s16 + $0x20] sm:$0xff]  ;;  %s756_s8 = sshll.u32 %s952_s24, 2  ;;  %s385_s13 = scalar_lea.vmem %s946_s7, %s755_s23 }
  0x10   : > { %v399_v8 = vpack.c.bf16 %v395_v6, %v393_v5  ;;  %v394_v9 = vld [vmem:[%s349_s16 + $0x30] sm:$0xff]  ;;  %v389_v10 = vld [vmem:[%s349_s16 + $0x8] sm:$0xff]  ;;  %v391_v11 = vld [vmem:[%s349_s16 + $0x18] sm:$0xff]  ;;  %s375_s17 = scalar_lea.vmem %s945_s6, %s756_s8 }
  0x11   : > { %v398_v12 = vpack.c.bf16 %v394_v9, %v392_v7  ;;  %v397_v13 = vpack.c.bf16 %v391_v11, %v389_v10  ;;  %v388_v14 = vld [vmem:[%s349_s16] sm:$0xff]  ;;  %v390_v15 = vld [vmem:[%s349_s16 + $0x10] sm:$0xff]  ;;  %v520_v34 = vld [vmem:[%s943_s4 + $0x8] sm:$0xff] }
  0x12   : > { %448 = vmatprep.subr.bf16.mxu0 %v399_v8  ;;  %758 = vmatprep.subr.bf16.mxu1 %v399_v8  ;;  %v396_v17 = vpack.c.bf16 %v390_v15, %v388_v14  ;;  %v519_v28 = vld [vmem:[%s943_s4] sm:$0xff] }
  0x13   : > { %413 = vperm.xlu0 %787, %v404_v3   ;;  %507 = vperm.xlu1 %788, %v503_v4  }
  0x14   : > { %449 = vmatpush1.bf16.msra.mxu0 %v398_v12  ;;  %760 = vmatpush1.bf16.msra.mxu1 %v398_v12 }
  0x15   : > { %450 = vmatprep.subr.bf16.mxu0 %v397_v13  ;;  %759 = vmatprep.subr.bf16.mxu1 %v397_v13 }
  0x17   : > { %512 = vperm.xlu0 %787, %v504_v16  }
  0x18   : > { %451 = vmatpush1.bf16.msra.mxu0 %v396_v17  ;;  %761 = vmatpush1.bf16.msra.mxu1 %v396_v17 }
  0x1b   : > { %749 = vmatmul.mubr.msk.bf16.vlgmr.msra.gmra.mxu0 %vm429_vm0, %v789_v18  ;;  %750 = vmatmul.mubr.msk.bf16.vlgmr.msra.gmra.mxu1 %vm429_vm0, %v790_v19 }
  0x8a   : > { %v409_v20 = vpop.permute.xlu0 %408  ;;  %v419_v21 = vpop.permute.xlu1 %418 }
  0x8e   : > { %v414_v22 = vpop.permute.xlu0 %413  ;;  %v508_v23 = vpop.permute.xlu1 %507 }
  0x92   : > { %v513_v37 = vpop.permute.xlu0 %512 }
  0xdb   : > { %v470_v24 = vpop.f32.mrf.mxu0  ;;  %v480_v25 = vpop.f32.mrf.mxu1 }
  0xdc   : > { %v471_v26 = vadd.f32 %v470_v24, %v409_v20  ;;  %v481_v27 = vadd.f32 %v480_v25, %v419_v21 }
  0xdd   : > { %v472_v29 = vpop.f32.mrf.mxu0  ;;  %v482_v30 = vpop.f32.mrf.mxu1 }
  0xde   : > { %487 = vst [vmem:[%s905_s30] sm:$0xff] %v471_v26  ;;  %v515_v31 = vmul.f32 %v508_v23, %v471_v26  ;;  %v473_v32 = vadd.f32 %v472_v29, %v409_v20  ;;  %v483_v33 = vadd.f32 %v482_v30, %v419_v21 }
  0xdf   : > { %v474_v35 = vpop.f32.mrf.mxu0  ;;  %v484_v36 = vpop.f32.mrf.mxu1 }
  0xe0   : > { %v523_v38 = vadd.f32 %v519_v28, %v515_v31  ;;  %488 = vst [vmem:[%s905_s30 + $0x8] sm:$0xff] %v473_v32  ;;  %v516_v39 = vmul.f32 %v508_v23, %v473_v32  ;;  %v493_v40 = vcombine.low %v481_v27, %v483_v33  ;;  %v475_v41 = vadd.f32 %v474_v35, %v414_v22 }
  0xe1   : > { %v476_v43 = vpop.f32.mrf.mxu0  ;;  %v485_v44 = vpop.f32.mrf.mxu1 }
  0xe2   : > { %527 = vst [vmem:[%s385_s13] sm:$0xff] %v523_v38  ;;  %v524_v45 = vadd.f32 %v520_v34, %v516_v39  ;;  %751 = vst.sshfl [vmem:[%s375_s17] sm:$0x33 pattern:$0x76325410] %v493_v40  ;;  %v517_v46 = vmul.f32 %v513_v37, %v475_v41  ;;  %v477_v47 = vadd.f32 %v476_v43, %v414_v22 }
  0xe3   : > { %489 = vst [vmem:[%s905_s30 + $0x10] sm:$0xff] %v475_v41 }
  0xe4   : > { %528 = vst [vmem:[%s385_s13 + $0x8] sm:$0xff] %v524_v45  ;;  %v525_v49 = vadd.f32 %v521_v42, %v517_v46  ;;  %490 = vst [vmem:[%s905_s30 + $0x18] sm:$0xff] %v477_v47  ;;  %v518_v50 = vmul.f32 %v513_v37, %v477_v47 }
  0xe6   : > { %529 = vst [vmem:[%s385_s13 + $0x10] sm:$0xff] %v525_v49  ;;  %v526_v51 = vadd.f32 %v522_v48, %v518_v50 }
  0xe8   : > { %530 = vst [vmem:[%s385_s13 + $0x18] sm:$0xff] %v526_v51 }
  0xe9 PF: > { %s18_s26 = sadd.s32 1, %s813_s26   ;;  %s947_s24 = smov %s809_s25 }
  0xea   : > { %p15_p5 = scmp.ge.s32.totalorder %s18_s26, 5   ;;  %s948_s25 = smov %s950_s27 }
  0xec   :  { %17 = sbr.rel (!%p15_p5) target bundleno = 2 (0x2), region = 97 }

</bundles_post_ra>
